<compile_context>
chip_gen: v7x
topology: tpu7x:2x2x1
jax: 0.10.0
libtpu: 0.0.40
codegen_flags: <defaults>
</compile_context>

<pallas_src>
import functools
import math

import numpy as np
import jax
import jax.numpy as jnp
from jax import lax
from jax.experimental import pallas as pl
from jax.experimental.pallas import tpu as pltpu


def _cross_att_kernel(*refs, num_heads, head_size, bt, sq, sk, hidden,
                      ln_eps, has_mask, has_gate):
    refs = list(refs)
    ctx_acc = refs.pop()          # VMEM scratch (Bt*Sq, H) f32
    o_ref = refs.pop()            # output block (Bt, Sq, H)
    x_ref, c_ref = refs[0], refs[1]
    idx = 2
    mask_ref = gate_ref = None
    if has_mask:
        mask_ref = refs[idx]; idx += 1
    if has_gate:
        gate_ref = refs[idx]; idx += 1
    (wq_ref, bq_ref, wkv_ref, bkv_ref,
     wo_ref, bo_ref, g_ref, beta_ref) = refs[idx:idx + 8]

    f32 = jnp.float32
    bf16 = jnp.bfloat16
    scale = 1.0 / math.sqrt(head_size)

    # bf16 activations, flattened so the projection matmuls see a big M dim.
    x_bf = x_ref[...].reshape(bt * sq, hidden)           # (Bt*Sq, H) bf16
    c_bf = c_ref[...].reshape(bt * sk, hidden)           # (Bt*Sk, H) bf16

    # Q projection: bf16 MXU, f32 accumulate; fold 1/sqrt(dh) once, one bf16 cast.
    q = jnp.dot(x_bf, wq_ref[...], preferred_element_type=f32) + bq_ref[...]
    q_bf = (q * scale).astype(bf16)                      # (Bt*Sq, H)

    # Fused K|V projection: single (H, 2H) matmul.
    kv = jnp.dot(c_bf, wkv_ref[...], preferred_element_type=f32) + bkv_ref[...]
    kv_bf = kv.astype(bf16)                              # (Bt*Sk, 2H)

    for bl in range(bt):                                 # static unroll over folded batch
        q_b = q_bf[bl * sq:(bl + 1) * sq, :]             # (Sq, H)
        k_b = kv_bf[bl * sk:(bl + 1) * sk, :hidden]      # (Sk, H)
        v_b = kv_bf[bl * sk:(bl + 1) * sk, hidden:]      # (Sk, H)
        if has_mask:
            m_b = mask_ref[bl]                           # (1, Sk) f32
        if has_gate:
            g_b = gate_ref[bl]                           # (1, Sk) f32
        for h in range(num_heads):                       # static unroll, lane slices
            lo = h * head_size
            qh = q_b[:, lo:lo + head_size]               # (Sq, dh) bf16
            kh = k_b[:, lo:lo + head_size]               # (Sk, dh) bf16
            vh = v_b[:, lo:lo + head_size]               # (Sk, dh) bf16
            # scores = qh @ kh.T (scale already folded into q), f32 accumulation
            s = lax.dot_general(qh, kh, (((1,), (1,)), ((), ())),
                                preferred_element_type=f32)
            if has_mask:
                if has_gate:
                    s = s * g_b + m_b
                else:
                    s = s + m_b
            s = s - jnp.max(s, axis=-1, keepdims=True)
            p = jnp.exp(s)
            p = p * pl.reciprocal(jnp.sum(p, axis=-1, keepdims=True), approx=True)
            # Write this head's context slab straight into the VMEM accumulator.
            ctx_acc[bl * sq:(bl + 1) * sq, lo:lo + head_size] = jnp.dot(
                p.astype(bf16), vh, preferred_element_type=f32)

    # Output dense + residual (f32) + LayerNorm (f32 stats, rsqrt on the EUP).
    attn_bf = ctx_acc[...].astype(bf16)
    out = jnp.dot(attn_bf, wo_ref[...], preferred_element_type=f32) + bo_ref[...]
    out = out + x_bf.astype(f32)                         # residual with input_tensor
    mean = jnp.mean(out, axis=-1, keepdims=True)
    cen = out - mean
    var = jnp.mean(cen * cen, axis=-1, keepdims=True)
    normed = cen * lax.rsqrt(var + ln_eps)
    y = normed * g_ref[...] + beta_ref[...]
    o_ref[...] = y.reshape(bt, sq, hidden).astype(o_ref.dtype)


def _pick_batch_tile(batch, sq):
    """Fold batch rows so Bt*Sq ~ 256 (MXU M-fill) while keeping >= 2 grid steps."""
    bt = max(1, min(batch, 256 // max(1, sq)))
    while bt > 1 and (batch // bt) < 2:      # keep both v7x TensorCores busy
        bt = max(1, bt // 2)
    while batch % bt != 0:                   # simple blocking needs divisibility
        bt -= 1
    return max(bt, 1)


def bert_crossatt_forward(input_tensor, ctx_tensor, params, *, num_heads,
                          ctx_att_mask=None, ctx_att_gate=None):
    """Fused BertCrossattLayer forward. Returns (B, Sq, H) in input_tensor.dtype."""
    wq, bq, wk, bk, wv, bv, wo, bo, gamma, beta = params
    B, Sq, H = input_tensor.shape
    Sk = ctx_tensor.shape[1]
    assert H % num_heads == 0
    head_size = H // num_heads

    has_mask = ctx_att_mask is not None
    has_gate = has_mask and (ctx_att_gate is not None)   # PyTorch only gates with a mask

    bt = _pick_batch_tile(B, Sq)
    grid = (B // bt,)

    bf16, f32 = jnp.bfloat16, jnp.float32
    x_bf = input_tensor.astype(bf16)
    c_bf = ctx_tensor.astype(bf16)
    wq_bf = wq.astype(bf16)
    wkv_bf = jnp.concatenate([wk, wv], axis=1).astype(bf16)     # (H, 2H)
    bkv = jnp.concatenate([bk, bv], axis=1).astype(f32)         # (1, 2H)
    wo_bf = wo.astype(bf16)

    kernel = functools.partial(
        _cross_att_kernel, num_heads=num_heads, head_size=head_size,
        bt=bt, sq=Sq, sk=Sk, hidden=H, ln_eps=1e-12,
        has_mask=has_mask, has_gate=has_gate)

    # --- specs ---------------------------------------------------------------
    x_spec = pl.BlockSpec((bt, Sq, H), lambda i: (i, 0, 0))
    c_spec = pl.BlockSpec((bt, Sk, H), lambda i: (i, 0, 0))
    m_spec = pl.BlockSpec((bt, 1, Sk), lambda i: (i, 0, 0))
    w_hh = pl.BlockSpec((H, H), lambda i: (0, 0))        # VMEM-resident across steps
    w_h2h = pl.BlockSpec((H, 2 * H), lambda i: (0, 0))
    b_h = pl.BlockSpec((1, H), lambda i: (0, 0))
    b_2h = pl.BlockSpec((1, 2 * H), lambda i: (0, 0))
    out_spec = pl.BlockSpec((bt, Sq, H), lambda i: (i, 0, 0))

    in_specs = [x_spec, c_spec]
    args = [x_bf, c_bf]
    if has_mask:
        in_specs.append(m_spec)
        args.append(ctx_att_mask.reshape(B, 1, Sk).astype(f32))
    if has_gate:
        in_specs.append(m_spec)
        args.append(ctx_att_gate.reshape(B, 1, Sk).astype(f32))
    in_specs += [w_hh, b_h, w_h2h, b_2h, w_hh, b_h, b_h, b_h]
    args += [wq_bf, bq.astype(f32), wkv_bf, bkv, wo_bf, bo.astype(f32),
             gamma.astype(f32), beta.astype(f32)]

    # --- advisory cost / VMEM budget ------------------------------------------
    flops = B * (4 * Sq * H * H + 4 * Sk * H * H + 4 * Sq * Sk * H)
    transcendentals = B * (num_heads * Sq * Sk + num_heads * Sq + Sq)
    bytes_accessed = (2 * B * (Sq + Sk) * H          # bf16 x, ctx
                      + 4 * B * Sq * H               # f32 output
                      + 2 * 4 * H * H                # bf16 Wq|Wkv|Wo
                      + 4 * 8 * H                    # f32 biases + LN params
                      + (4 * B * Sk if has_mask else 0)
                      + (4 * B * Sk if has_gate else 0))
    cost = pl.CostEstimate(flops=flops, transcendentals=transcendentals,
                           bytes_accessed=bytes_accessed)

    resident = 2 * 4 * H * H + 4 * 8 * H
    per_step = 2 * bt * (Sq + Sk) * H + 4 * bt * Sq * H + 8 * bt * Sk
    scratch_b = 4 * bt * Sq * H
    needed = 2 * (resident + per_step) + scratch_b + (8 << 20)   # 2x for double buffers
    vmem_limit = int(min(max(needed, 32 << 20), 64 << 20))       # safe on v5e/v6e/v7x

    return pl.pallas_call(
        kernel,
        out_shape=jax.ShapeDtypeStruct((B, Sq, H), input_tensor.dtype),
        grid=grid,
        in_specs=in_specs,
        out_specs=out_spec,
        scratch_shapes=[pltpu.VMEM((bt * Sq, H), jnp.float32)],
        compiler_params=pltpu.CompilerParams(
            dimension_semantics=("parallel",),
            vmem_limit_bytes=vmem_limit),
        cost_estimate=cost,
    )(*args)


def init_params(key, hidden_size):
    """nn.Linear-style uniform init; LayerNorm at its default ones/zeros."""
    ks = jax.random.split(key, 8)
    bound = 1.0 / np.sqrt(hidden_size)

    def lin(kw, kb):
        w = jax.random.uniform(kw, (hidden_size, hidden_size), jnp.float32,
                               -bound, bound)
        b = jax.random.uniform(kb, (1, hidden_size), jnp.float32, -bound, bound)
        return w, b

    wq, bq = lin(ks[0], ks[1])
    wk, bk = lin(ks[2], ks[3])
    wv, bv = lin(ks[4], ks[5])
    wo, bo = lin(ks[6], ks[7])
    gamma = jnp.ones((1, hidden_size), jnp.float32)
    beta = jnp.zeros((1, hidden_size), jnp.float32)
    return wq, bq, wk, bk, wv, bv, wo, bo, gamma, beta


def _reference_forward(x, c, params, num_heads,
                       ctx_att_mask=None, ctx_att_gate=None):
    """Plain-JAX mirror of the PyTorch module using the same bf16-matmul policy."""
    wq, bq, wk, bk, wv, bv, wo, bo, gamma, beta = params
    B, Sq, H = x.shape
    Sk = c.shape[1]
    dh = H // num_heads
    bf, f32 = jnp.bfloat16, jnp.float32

    xb, cb = x.astype(bf), c.astype(bf)
    q = (jnp.dot(xb, wq.astype(bf), preferred_element_type=f32) + bq[0]) * (1.0 / np.sqrt(dh))
    k = jnp.dot(cb, wk.astype(bf), preferred_element_type=f32) + bk[0]
    v = jnp.dot(cb, wv.astype(bf), preferred_element_type=f32) + bv[0]
    qb, kb, vb = q.astype(bf), k.astype(bf), v.astype(bf)

    def heads(t, S):
        return t.reshape(B, S, num_heads, dh).transpose(0, 2, 1, 3)

    s = jnp.einsum('bhqd,bhkd->bhqk', heads(qb, Sq), heads(kb, Sk),
                   preferred_element_type=f32)
    if ctx_att_mask is not None:
        m = ctx_att_mask.reshape(B, 1, 1, Sk)
        if ctx_att_gate is not None:
            s = s * ctx_att_gate.reshape(B, 1, 1, Sk) + m
        else:
            s = s + m
    p = jax.nn.softmax(s, axis=-1)
    ctx = jnp.einsum('bhqk,bhkd->bhqd', p.astype(bf), heads(vb, Sk),
                     preferred_element_type=f32)
    ctx = ctx.transpose(0, 2, 1, 3).reshape(B, Sq, H)
    out = (jnp.dot(ctx.astype(bf), wo.astype(bf), preferred_element_type=f32)
           + bo[0] + xb.astype(f32))
    mean = out.mean(-1, keepdims=True)
    cen = out - mean
    var = (cen * cen).mean(-1, keepdims=True)
    return cen * lax.rsqrt(var + 1e-12) * gamma[0] + beta[0]


if __name__ == "__main__":
    B, Sq, Sk, H, NH = 2, 8, 16, 32, 4   # batch, query len, ctx len, hidden, heads

    key = jax.random.PRNGKey(0)
    kp, kx, kc = jax.random.split(key, 3)

    params = init_params(kp, H)
    x = jax.random.normal(kx, (B, Sq, H), jnp.float32)
    ctx = jax.random.normal(kc, (B, Sk, H), jnp.float32)

    # BERT-style additive padding mask: batch 0 attends to all 16 ctx tokens,
    # batch 1 only to the first 12.
    valid = jnp.arange(Sk)[None, :] < jnp.array([[16], [12]])
    mask = jnp.where(valid, 0.0, -10000.0).astype(jnp.float32).reshape(B, 1, Sk)

    # With mask.
    out = bert_crossatt_forward(x, ctx, params, num_heads=NH, ctx_att_mask=mask)
    out = jax.block_until_ready(out)
    ref = _reference_forward(x, ctx, params, NH, ctx_att_mask=mask)
    assert out.shape == (B, Sq, H)
    np.testing.assert_allclose(np.asarray(out), np.asarray(ref),
                               rtol=5e-3, atol=5e-3)

    # Without mask (exercises the specialized no-mask/no-gate kernel path).
    out_nm = bert_crossatt_forward(x, ctx, params, num_heads=NH)
    out_nm = jax.block_until_ready(out_nm)
    ref_nm = _reference_forward(x, ctx, params, NH)
    np.testing.assert_allclose(np.asarray(out_nm), np.asarray(ref_nm),
                               rtol=5e-3, atol=5e-3)

    print("KERNEL_OK")
</pallas_src>

<mosaic_0001>
module attributes {stable_mosaic.version = 11 : i64} {
  func.func @_cross_att_kernel(%arg0: i32, %arg1: memref<1x8x32xbf16, #tpu.memory_space<vmem>>, %arg2: memref<1x16x32xbf16, #tpu.memory_space<vmem>>, %arg3: memref<1x1x16xf32, #tpu.memory_space<vmem>>, %arg4: memref<32x32xbf16, #tpu.memory_space<vmem>>, %arg5: memref<1x32xf32, #tpu.memory_space<vmem>>, %arg6: memref<32x64xbf16, #tpu.memory_space<vmem>>, %arg7: memref<1x64xf32, #tpu.memory_space<vmem>>, %arg8: memref<32x32xbf16, #tpu.memory_space<vmem>>, %arg9: memref<1x32xf32, #tpu.memory_space<vmem>>, %arg10: memref<1x32xf32, #tpu.memory_space<vmem>>, %arg11: memref<1x32xf32, #tpu.memory_space<vmem>>, %arg12: memref<1x8x32xf32, #tpu.memory_space<vmem>>, %arg13: memref<8x32xf32, #tpu.memory_space<vmem>>) attributes {dimension_semantics = [#tpu.dimension_semantics<parallel>], iteration_bounds = array<i64: 2>, scalar_prefetch = 0 : i64, scratch_operands = 1 : i64, tpu.core_type = #tpu.core_type<tc>, window_params = [{transform_indices = @transform_0, window_bounds = array<i64: 1, 8, 32>}, {transform_indices = @transform_1, window_bounds = array<i64: 1, 16, 32>}, {transform_indices = @transform_2, window_bounds = array<i64: 1, 1, 16>}, {pipeline_mode = #tpu.pipeline_mode<synchronous>, transform_indices = @transform_3, window_bounds = array<i64: 32, 32>}, {pipeline_mode = #tpu.pipeline_mode<synchronous>, transform_indices = @transform_4, window_bounds = array<i64: 1, 32>}, {pipeline_mode = #tpu.pipeline_mode<synchronous>, transform_indices = @transform_5, window_bounds = array<i64: 32, 64>}, {pipeline_mode = #tpu.pipeline_mode<synchronous>, transform_indices = @transform_6, window_bounds = array<i64: 1, 64>}, {pipeline_mode = #tpu.pipeline_mode<synchronous>, transform_indices = @transform_7, window_bounds = array<i64: 32, 32>}, {pipeline_mode = #tpu.pipeline_mode<synchronous>, transform_indices = @transform_8, window_bounds = array<i64: 1, 32>}, {pipeline_mode = #tpu.pipeline_mode<synchronous>, transform_indices = @transform_9, window_bounds = array<i64: 1, 32>}, {pipeline_mode = #tpu.pipeline_mode<synchronous>, transform_indices = @transform_10, window_bounds = array<i64: 1, 32>}, {transform_indices = @transform_11, window_bounds = array<i64: 1, 8, 32>}]} {
    %c0 = arith.constant 0 : index
    %c0_0 = arith.constant 0 : index
    %c0_1 = arith.constant 0 : index
    %0 = vector.load %arg1[%c0, %c0_0, %c0_1] : memref<1x8x32xbf16, #tpu.memory_space<vmem>>, vector<1x8x32xbf16>
    %1 = vector.shape_cast %0 : vector<1x8x32xbf16> to vector<8x32xbf16>
    %c0_2 = arith.constant 0 : index
    %c0_3 = arith.constant 0 : index
    %c0_4 = arith.constant 0 : index
    %2 = vector.load %arg2[%c0_2, %c0_3, %c0_4] : memref<1x16x32xbf16, #tpu.memory_space<vmem>>, vector<1x16x32xbf16>
    %3 = vector.shape_cast %2 : vector<1x16x32xbf16> to vector<16x32xbf16>
    %c0_5 = arith.constant 0 : index
    %c0_6 = arith.constant 0 : index
    %4 = vector.load %arg4[%c0_5, %c0_6] : memref<32x32xbf16, #tpu.memory_space<vmem>>, vector<32x32xbf16>
    %cst = arith.constant dense<0.000000e+00> : vector<8x32xf32>
    %5 = tpu.matmul %1, %4, %cst {dimension_numbers = #tpu.dot_dimension_numbers<[1], [0], [0], [1], [0, 0, 1, 1], [], []>} : vector<8x32xbf16>, vector<32x32xbf16>, vector<8x32xf32> -> vector<8x32xf32>
    %c0_7 = arith.constant 0 : index
    %c0_8 = arith.constant 0 : index
    %6 = vector.load %arg5[%c0_7, %c0_8] : memref<1x32xf32, #tpu.memory_space<vmem>>, vector<1x32xf32>
    %7 = vector.broadcast %6 : vector<1x32xf32> to vector<8x32xf32>
    %8 = arith.addf %5, %7 : vector<8x32xf32>
    %cst_9 = arith.constant 0.353553385 : f32
    %9 = vector.broadcast %cst_9 : f32 to vector<8x32xf32>
    %10 = arith.mulf %8, %9 : vector<8x32xf32>
    %11 = arith.truncf %10 : vector<8x32xf32> to vector<8x32xbf16>
    %c0_10 = arith.constant 0 : index
    %c0_11 = arith.constant 0 : index
    %12 = vector.load %arg6[%c0_10, %c0_11] : memref<32x64xbf16, #tpu.memory_space<vmem>>, vector<32x64xbf16>
    %cst_12 = arith.constant dense<0.000000e+00> : vector<16x64xf32>
    %13 = tpu.matmul %3, %12, %cst_12 {dimension_numbers = #tpu.dot_dimension_numbers<[1], [0], [0], [1], [0, 0, 1, 1], [], []>} : vector<16x32xbf16>, vector<32x64xbf16>, vector<16x64xf32> -> vector<16x64xf32>
    %c0_13 = arith.constant 0 : index
    %c0_14 = arith.constant 0 : index
    %14 = vector.load %arg7[%c0_13, %c0_14] : memref<1x64xf32, #tpu.memory_space<vmem>>, vector<1x64xf32>
    %15 = vector.broadcast %14 : vector<1x64xf32> to vector<16x64xf32>
    %16 = arith.addf %13, %15 : vector<16x64xf32>
    %17 = arith.truncf %16 : vector<16x64xf32> to vector<16x64xbf16>
    %18 = vector.extract_strided_slice %17 {offsets = [0, 0], sizes = [16, 32], strides = [1, 1]} : vector<16x64xbf16> to vector<16x32xbf16>
    %19 = vector.extract_strided_slice %17 {offsets = [0, 32], sizes = [16, 32], strides = [1, 1]} : vector<16x64xbf16> to vector<16x32xbf16>
    %c0_15 = arith.constant 0 : index
    %c0_16 = arith.constant 0 : index
    %c0_17 = arith.constant 0 : index
    %20 = vector.load %arg3[%c0_15, %c0_16, %c0_17] : memref<1x1x16xf32, #tpu.memory_space<vmem>>, vector<1x1x16xf32>
    %21 = vector.shape_cast %20 : vector<1x1x16xf32> to vector<1x16xf32>
    %22 = vector.extract_strided_slice %11 {offsets = [0, 0], sizes = [8, 8], strides = [1, 1]} : vector<8x32xbf16> to vector<8x8xbf16>
    %23 = vector.extract_strided_slice %18 {offsets = [0, 0], sizes = [16, 8], strides = [1, 1]} : vector<16x32xbf16> to vector<16x8xbf16>
    %24 = vector.extract_strided_slice %19 {offsets = [0, 0], sizes = [16, 8], strides = [1, 1]} : vector<16x32xbf16> to vector<16x8xbf16>
    %cst_18 = arith.constant dense<0.000000e+00> : vector<8x16xf32>
    %25 = tpu.matmul %22, %23, %cst_18 {dimension_numbers = #tpu.dot_dimension_numbers<[1], [1], [0], [0], [0, 0, 1, 0], [], []>} : vector<8x8xbf16>, vector<16x8xbf16>, vector<8x16xf32> -> vector<8x16xf32>
    %26 = vector.broadcast %21 : vector<1x16xf32> to vector<8x16xf32>
    %27 = arith.addf %25, %26 : vector<8x16xf32>
    %cst_19 = arith.constant dense<0xFF800000> : vector<8xf32>
    %28 = vector.multi_reduction <maximumf>, %27, %cst_19 [1] : vector<8x16xf32> to vector<8xf32>
    %29 = vector.shape_cast %28 : vector<8xf32> to vector<8x1xf32>
    %30 = vector.broadcast %29 : vector<8x1xf32> to vector<8x16xf32>
    %31 = arith.subf %27, %30 : vector<8x16xf32>
    %32 = math.exp %31 : vector<8x16xf32>
    %cst_20 = arith.constant dense<0.000000e+00> : vector<8xf32>
    %33 = vector.multi_reduction <add>, %32, %cst_20 [1] : vector<8x16xf32> to vector<8xf32>
    %34 = vector.shape_cast %33 : vector<8xf32> to vector<8x1xf32>
    %35 = tpu.reciprocal %34 {approx = true} : vector<8x1xf32> -> vector<8x1xf32>
    %36 = vector.broadcast %35 : vector<8x1xf32> to vector<8x16xf32>
    %37 = arith.mulf %32, %36 : vector<8x16xf32>
    %38 = arith.truncf %37 : vector<8x16xf32> to vector<8x16xbf16>
    %cst_21 = arith.constant dense<0.000000e+00> : vector<8x8xf32>
    %39 = tpu.matmul %38, %24, %cst_21 {dimension_numbers = #tpu.dot_dimension_numbers<[1], [0], [0], [1], [0, 0, 1, 1], [], []>} : vector<8x16xbf16>, vector<16x8xbf16>, vector<8x8xf32> -> vector<8x8xf32>
    %c0_22 = arith.constant 0 : index
    %c0_23 = arith.constant 0 : index
    %40 = vector.load %arg13[%c0_22, %c0_23] : memref<8x32xf32, #tpu.memory_space<vmem>>, vector<8x8xf32>
    tpu.vector_store %arg13[%c0_22, %c0_23], %39 {strides = array<i32>} : memref<8x32xf32, #tpu.memory_space<vmem>>, vector<8x8xf32>,
    %41 = vector.extract_strided_slice %11 {offsets = [0, 8], sizes = [8, 8], strides = [1, 1]} : vector<8x32xbf16> to vector<8x8xbf16>
    %42 = vector.extract_strided_slice %18 {offsets = [0, 8], sizes = [16, 8], strides = [1, 1]} : vector<16x32xbf16> to vector<16x8xbf16>
    %43 = vector.extract_strided_slice %19 {offsets = [0, 8], sizes = [16, 8], strides = [1, 1]} : vector<16x32xbf16> to vector<16x8xbf16>
    %cst_24 = arith.constant dense<0.000000e+00> : vector<8x16xf32>
    %44 = tpu.matmul %41, %42, %cst_24 {dimension_numbers = #tpu.dot_dimension_numbers<[1], [1], [0], [0], [0, 0, 1, 0], [], []>} : vector<8x8xbf16>, vector<16x8xbf16>, vector<8x16xf32> -> vector<8x16xf32>
    %45 = vector.broadcast %21 : vector<1x16xf32> to vector<8x16xf32>
    %46 = arith.addf %44, %45 : vector<8x16xf32>
    %cst_25 = arith.constant dense<0xFF800000> : vector<8xf32>
    %47 = vector.multi_reduction <maximumf>, %46, %cst_25 [1] : vector<8x16xf32> to vector<8xf32>
    %48 = vector.shape_cast %47 : vector<8xf32> to vector<8x1xf32>
    %49 = vector.broadcast %48 : vector<8x1xf32> to vector<8x16xf32>
    %50 = arith.subf %46, %49 : vector<8x16xf32>
    %51 = math.exp %50 : vector<8x16xf32>
    %cst_26 = arith.constant dense<0.000000e+00> : vector<8xf32>
    %52 = vector.multi_reduction <add>, %51, %cst_26 [1] : vector<8x16xf32> to vector<8xf32>
    %53 = vector.shape_cast %52 : vector<8xf32> to vector<8x1xf32>
    %54 = tpu.reciprocal %53 {approx = true} : vector<8x1xf32> -> vector<8x1xf32>
    %55 = vector.broadcast %54 : vector<8x1xf32> to vector<8x16xf32>
    %56 = arith.mulf %51, %55 : vector<8x16xf32>
    %57 = arith.truncf %56 : vector<8x16xf32> to vector<8x16xbf16>
    %cst_27 = arith.constant dense<0.000000e+00> : vector<8x8xf32>
    %58 = tpu.matmul %57, %43, %cst_27 {dimension_numbers = #tpu.dot_dimension_numbers<[1], [0], [0], [1], [0, 0, 1, 1], [], []>} : vector<8x16xbf16>, vector<16x8xbf16>, vector<8x8xf32> -> vector<8x8xf32>
    %c0_28 = arith.constant 0 : index
    %c8 = arith.constant 8 : index
    %59 = vector.load %arg13[%c0_28, %c8] : memref<8x32xf32, #tpu.memory_space<vmem>>, vector<8x8xf32>
    tpu.vector_store %arg13[%c0_28, %c8], %58 {strides = array<i32>} : memref<8x32xf32, #tpu.memory_space<vmem>>, vector<8x8xf32>,
    %60 = vector.extract_strided_slice %11 {offsets = [0, 16], sizes = [8, 8], strides = [1, 1]} : vector<8x32xbf16> to vector<8x8xbf16>
    %61 = vector.extract_strided_slice %18 {offsets = [0, 16], sizes = [16, 8], strides = [1, 1]} : vector<16x32xbf16> to vector<16x8xbf16>
    %62 = vector.extract_strided_slice %19 {offsets = [0, 16], sizes = [16, 8], strides = [1, 1]} : vector<16x32xbf16> to vector<16x8xbf16>
    %cst_29 = arith.constant dense<0.000000e+00> : vector<8x16xf32>
    %63 = tpu.matmul %60, %61, %cst_29 {dimension_numbers = #tpu.dot_dimension_numbers<[1], [1], [0], [0], [0, 0, 1, 0], [], []>} : vector<8x8xbf16>, vector<16x8xbf16>, vector<8x16xf32> -> vector<8x16xf32>
    %64 = vector.broadcast %21 : vector<1x16xf32> to vector<8x16xf32>
    %65 = arith.addf %63, %64 : vector<8x16xf32>
    %cst_30 = arith.constant dense<0xFF800000> : vector<8xf32>
    %66 = vector.multi_reduction <maximumf>, %65, %cst_30 [1] : vector<8x16xf32> to vector<8xf32>
    %67 = vector.shape_cast %66 : vector<8xf32> to vector<8x1xf32>
    %68 = vector.broadcast %67 : vector<8x1xf32> to vector<8x16xf32>
    %69 = arith.subf %65, %68 : vector<8x16xf32>
    %70 = math.exp %69 : vector<8x16xf32>
    %cst_31 = arith.constant dense<0.000000e+00> : vector<8xf32>
    %71 = vector.multi_reduction <add>, %70, %cst_31 [1] : vector<8x16xf32> to vector<8xf32>
    %72 = vector.shape_cast %71 : vector<8xf32> to vector<8x1xf32>
    %73 = tpu.reciprocal %72 {approx = true} : vector<8x1xf32> -> vector<8x1xf32>
    %74 = vector.broadcast %73 : vector<8x1xf32> to vector<8x16xf32>
    %75 = arith.mulf %70, %74 : vector<8x16xf32>
    %76 = arith.truncf %75 : vector<8x16xf32> to vector<8x16xbf16>
    %cst_32 = arith.constant dense<0.000000e+00> : vector<8x8xf32>
    %77 = tpu.matmul %76, %62, %cst_32 {dimension_numbers = #tpu.dot_dimension_numbers<[1], [0], [0], [1], [0, 0, 1, 1], [], []>} : vector<8x16xbf16>, vector<16x8xbf16>, vector<8x8xf32> -> vector<8x8xf32>
    %c0_33 = arith.constant 0 : index
    %c16 = arith.constant 16 : index
    %78 = vector.load %arg13[%c0_33, %c16] : memref<8x32xf32, #tpu.memory_space<vmem>>, vector<8x8xf32>
    tpu.vector_store %arg13[%c0_33, %c16], %77 {strides = array<i32>} : memref<8x32xf32, #tpu.memory_space<vmem>>, vector<8x8xf32>,
    %79 = vector.extract_strided_slice %11 {offsets = [0, 24], sizes = [8, 8], strides = [1, 1]} : vector<8x32xbf16> to vector<8x8xbf16>
    %80 = vector.extract_strided_slice %18 {offsets = [0, 24], sizes = [16, 8], strides = [1, 1]} : vector<16x32xbf16> to vector<16x8xbf16>
    %81 = vector.extract_strided_slice %19 {offsets = [0, 24], sizes = [16, 8], strides = [1, 1]} : vector<16x32xbf16> to vector<16x8xbf16>
    %cst_34 = arith.constant dense<0.000000e+00> : vector<8x16xf32>
    %82 = tpu.matmul %79, %80, %cst_34 {dimension_numbers = #tpu.dot_dimension_numbers<[1], [1], [0], [0], [0, 0, 1, 0], [], []>} : vector<8x8xbf16>, vector<16x8xbf16>, vector<8x16xf32> -> vector<8x16xf32>
    %83 = vector.broadcast %21 : vector<1x16xf32> to vector<8x16xf32>
    %84 = arith.addf %82, %83 : vector<8x16xf32>
    %cst_35 = arith.constant dense<0xFF800000> : vector<8xf32>
    %85 = vector.multi_reduction <maximumf>, %84, %cst_35 [1] : vector<8x16xf32> to vector<8xf32>
    %86 = vector.shape_cast %85 : vector<8xf32> to vector<8x1xf32>
    %87 = vector.broadcast %86 : vector<8x1xf32> to vector<8x16xf32>
    %88 = arith.subf %84, %87 : vector<8x16xf32>
    %89 = math.exp %88 : vector<8x16xf32>
    %cst_36 = arith.constant dense<0.000000e+00> : vector<8xf32>
    %90 = vector.multi_reduction <add>, %89, %cst_36 [1] : vector<8x16xf32> to vector<8xf32>
    %91 = vector.shape_cast %90 : vector<8xf32> to vector<8x1xf32>
    %92 = tpu.reciprocal %91 {approx = true} : vector<8x1xf32> -> vector<8x1xf32>
    %93 = vector.broadcast %92 : vector<8x1xf32> to vector<8x16xf32>
    %94 = arith.mulf %89, %93 : vector<8x16xf32>
    %95 = arith.truncf %94 : vector<8x16xf32> to vector<8x16xbf16>
    %cst_37 = arith.constant dense<0.000000e+00> : vector<8x8xf32>
    %96 = tpu.matmul %95, %81, %cst_37 {dimension_numbers = #tpu.dot_dimension_numbers<[1], [0], [0], [1], [0, 0, 1, 1], [], []>} : vector<8x16xbf16>, vector<16x8xbf16>, vector<8x8xf32> -> vector<8x8xf32>
    %c0_38 = arith.constant 0 : index
    %c24 = arith.constant 24 : index
    %97 = vector.load %arg13[%c0_38, %c24] : memref<8x32xf32, #tpu.memory_space<vmem>>, vector<8x8xf32>
    tpu.vector_store %arg13[%c0_38, %c24], %96 {strides = array<i32>} : memref<8x32xf32, #tpu.memory_space<vmem>>, vector<8x8xf32>,
    %c0_39 = arith.constant 0 : index
    %c0_40 = arith.constant 0 : index
    %98 = vector.load %arg13[%c0_39, %c0_40] : memref<8x32xf32, #tpu.memory_space<vmem>>, vector<8x32xf32>
    %99 = arith.truncf %98 : vector<8x32xf32> to vector<8x32xbf16>
    %c0_41 = arith.constant 0 : index
    %c0_42 = arith.constant 0 : index
    %100 = vector.load %arg8[%c0_41, %c0_42] : memref<32x32xbf16, #tpu.memory_space<vmem>>, vector<32x32xbf16>
    %cst_43 = arith.constant dense<0.000000e+00> : vector<8x32xf32>
    %101 = tpu.matmul %99, %100, %cst_43 {dimension_numbers = #tpu.dot_dimension_numbers<[1], [0], [0], [1], [0, 0, 1, 1], [], []>} : vector<8x32xbf16>, vector<32x32xbf16>, vector<8x32xf32> -> vector<8x32xf32>
    %c0_44 = arith.constant 0 : index
    %c0_45 = arith.constant 0 : index
    %102 = vector.load %arg9[%c0_44, %c0_45] : memref<1x32xf32, #tpu.memory_space<vmem>>, vector<1x32xf32>
    %103 = vector.broadcast %102 : vector<1x32xf32> to vector<8x32xf32>
    %104 = arith.addf %101, %103 : vector<8x32xf32>
    %105 = arith.extf %1 : vector<8x32xbf16> to vector<8x32xf32>
    %106 = arith.addf %104, %105 : vector<8x32xf32>
    %cst_46 = arith.constant dense<0.000000e+00> : vector<8xf32>
    %107 = vector.multi_reduction <add>, %106, %cst_46 [1] : vector<8x32xf32> to vector<8xf32>
    %108 = vector.shape_cast %107 : vector<8xf32> to vector<8x1xf32>
    %cst_47 = arith.constant 3.200000e+01 : f32
    %109 = vector.broadcast %cst_47 : f32 to vector<8x1xf32>
    %110 = arith.divf %108, %109 : vector<8x1xf32>
    %111 = vector.broadcast %110 : vector<8x1xf32> to vector<8x32xf32>
    %112 = arith.subf %106, %111 : vector<8x32xf32>
    %113 = arith.mulf %112, %112 : vector<8x32xf32>
    %cst_48 = arith.constant dense<0.000000e+00> : vector<8xf32>
    %114 = vector.multi_reduction <add>, %113, %cst_48 [1] : vector<8x32xf32> to vector<8xf32>
    %115 = vector.shape_cast %114 : vector<8xf32> to vector<8x1xf32>
    %cst_49 = arith.constant 3.200000e+01 : f32
    %116 = vector.broadcast %cst_49 : f32 to vector<8x1xf32>
    %117 = arith.divf %115, %116 : vector<8x1xf32>
    %cst_50 = arith.constant 9.99999996E-13 : f32
    %118 = vector.broadcast %cst_50 : f32 to vector<8x1xf32>
    %119 = arith.addf %117, %118 : vector<8x1xf32>
    %120 = math.rsqrt %119 : vector<8x1xf32>
    %121 = vector.broadcast %120 : vector<8x1xf32> to vector<8x32xf32>
    %122 = arith.mulf %112, %121 : vector<8x32xf32>
    %c0_51 = arith.constant 0 : index
    %c0_52 = arith.constant 0 : index
    %123 = vector.load %arg10[%c0_51, %c0_52] : memref<1x32xf32, #tpu.memory_space<vmem>>, vector<1x32xf32>
    %124 = vector.broadcast %123 : vector<1x32xf32> to vector<8x32xf32>
    %125 = arith.mulf %122, %124 : vector<8x32xf32>
    %c0_53 = arith.constant 0 : index
    %c0_54 = arith.constant 0 : index
    %126 = vector.load %arg11[%c0_53, %c0_54] : memref<1x32xf32, #tpu.memory_space<vmem>>, vector<1x32xf32>
    %127 = vector.broadcast %126 : vector<1x32xf32> to vector<8x32xf32>
    %128 = arith.addf %125, %127 : vector<8x32xf32>
    %129 = vector.shape_cast %128 : vector<8x32xf32> to vector<1x8x32xf32>
    %c0_55 = arith.constant 0 : index
    %c0_56 = arith.constant 0 : index
    %c0_57 = arith.constant 0 : index
    %130 = vector.load %arg12[%c0_55, %c0_56, %c0_57] : memref<1x8x32xf32, #tpu.memory_space<vmem>>, vector<1x8x32xf32>
    tpu.vector_store %arg12[%c0_55, %c0_56, %c0_57], %129 {strides = array<i32>} : memref<1x8x32xf32, #tpu.memory_space<vmem>>, vector<1x8x32xf32>,
    return
  }
  func.func @transform_0(%arg0: i32) -> (i32, i32, i32) {
    %c0_i32 = arith.constant 0 : i32
    %c0_i32_0 = arith.constant 0 : i32
    %c0_i32_1 = arith.constant 0 : i32
    return %arg0, %c0_i32, %c0_i32_0 : i32, i32, i32
  }
  func.func @transform_1(%arg0: i32) -> (i32, i32, i32) {
    %c0_i32 = arith.constant 0 : i32
    %c0_i32_0 = arith.constant 0 : i32
    %c0_i32_1 = arith.constant 0 : i32
    return %arg0, %c0_i32, %c0_i32_0 : i32, i32, i32
  }
  func.func @transform_2(%arg0: i32) -> (i32, i32, i32) {
    %c0_i32 = arith.constant 0 : i32
    %c0_i32_0 = arith.constant 0 : i32
    %c0_i32_1 = arith.constant 0 : i32
    return %arg0, %c0_i32, %c0_i32_0 : i32, i32, i32
  }
  func.func @transform_3(%arg0: i32) -> (i32, i32) {
    %c0_i32 = arith.constant 0 : i32
    %c0_i32_0 = arith.constant 0 : i32
    %c0_i32_1 = arith.constant 0 : i32
    return %c0_i32, %c0_i32_0 : i32, i32
  }
  func.func @transform_4(%arg0: i32) -> (i32, i32) {
    %c0_i32 = arith.constant 0 : i32
    %c0_i32_0 = arith.constant 0 : i32
    %c0_i32_1 = arith.constant 0 : i32
    return %c0_i32, %c0_i32_0 : i32, i32
  }
  func.func @transform_5(%arg0: i32) -> (i32, i32) {
    %c0_i32 = arith.constant 0 : i32
    %c0_i32_0 = arith.constant 0 : i32
    %c0_i32_1 = arith.constant 0 : i32
    return %c0_i32, %c0_i32_0 : i32, i32
  }
  func.func @transform_6(%arg0: i32) -> (i32, i32) {
    %c0_i32 = arith.constant 0 : i32
    %c0_i32_0 = arith.constant 0 : i32
    %c0_i32_1 = arith.constant 0 : i32
    return %c0_i32, %c0_i32_0 : i32, i32
  }
  func.func @transform_7(%arg0: i32) -> (i32, i32) {
    %c0_i32 = arith.constant 0 : i32
    %c0_i32_0 = arith.constant 0 : i32
    %c0_i32_1 = arith.constant 0 : i32
    return %c0_i32, %c0_i32_0 : i32, i32
  }
  func.func @transform_8(%arg0: i32) -> (i32, i32) {
    %c0_i32 = arith.constant 0 : i32
    %c0_i32_0 = arith.constant 0 : i32
    %c0_i32_1 = arith.constant 0 : i32
    return %c0_i32, %c0_i32_0 : i32, i32
  }
  func.func @transform_9(%arg0: i32) -> (i32, i32) {
    %c0_i32 = arith.constant 0 : i32
    %c0_i32_0 = arith.constant 0 : i32
    %c0_i32_1 = arith.constant 0 : i32
    return %c0_i32, %c0_i32_0 : i32, i32
  }
  func.func @transform_10(%arg0: i32) -> (i32, i32) {
    %c0_i32 = arith.constant 0 : i32
    %c0_i32_0 = arith.constant 0 : i32
    %c0_i32_1 = arith.constant 0 : i32
    return %c0_i32, %c0_i32_0 : i32, i32
  }
  func.func @transform_11(%arg0: i32) -> (i32, i32, i32) {
    %c0_i32 = arith.constant 0 : i32
    %c0_i32_0 = arith.constant 0 : i32
    %c0_i32_1 = arith.constant 0 : i32
    return %arg0, %c0_i32, %c0_i32_0 : i32, i32, i32
  }
}

</mosaic_0001>

<bundles_post_ra>
// kernel: tpu_custom_call.1
= control target key start
LH: loop header
LB: loop body
LE: loop exit
PB: predicated region body
PF: predicated region fallthrough
CT: control target
= control target key end

     0   :  { %s2334_s0 = inlined_call_operand.hbm [shape: bf16[2,8,32], index: 0, kind: input, shape index: {}]   ;;  %s2335_s1 = inlined_call_operand.hbm [shape: bf16[2,16,32], index: 1, kind: input, shape index: {}]   ;;  %s2336_s2 = inlined_call_operand.vmem [shape: f32[2,1,16], index: 2, kind: input, shape index: {}]   ;;  %s2337_s3 = inlined_call_operand.hbm [shape: bf16[32,32], index: 3, kind: input, shape index: {}]   ;;  %s2338_s4 = inlined_call_operand.hbm [shape: f32[1,32], index: 4, kind: input, shape index: {}]   ;;  %s2339_s5 = inlined_call_operand.vmem [shape: bf16[32,64], index: 5, kind: input, shape index: {}]   ;;  %s2340_s6 = inlined_call_operand.vmem [shape: f32[1,64], index: 6, kind: input, shape index: {}]   ;;  %s2341_s7 = inlined_call_operand.hbm [shape: bf16[32,32], index: 7, kind: input, shape index: {}]   ;;  %s2342_s8 = inlined_call_operand.vmem [shape: f32[1,32], index: 8, kind: input, shape index: {}]   ;;  %s2343_s9 = inlined_call_operand.vmem [shape: f32[1,32], index: 9, kind: input, shape index: {}]   ;;  %s2344_s10 = inlined_call_operand.vmem [shape: f32[1,32], index: 10, kind: input, shape index: {}]   ;;  %s2345_s11 = inlined_call_operand.hbm [shape: f32[2,8,32], index: 11, kind: output, shape index: {}]  }
   0x1   :  { %2354 = sst [smem:[#allocation20_spill]] %s2334_s0 }
   0x2   :  { %2355 = sst [smem:[#allocation21_spill]] %s2337_s3 }
   0x3   :  { %2356 = sst [smem:[#allocation22_spill]] %s2343_s9 }
   0x4   :  { %2357 = sst [smem:[#allocation23_spill]] %s2344_s10 }
   0x5   :  { %2358 = sst [smem:[#allocation24_spill]] %s2345_s11 }
   0x6   :  { %16 = vsyncpa [#allocation4], 0 }
   0x7   :  { %18 = vsyncpa [#allocation4 + $0x1], 0 }
   0x8   :  { %19 = vsyncpa [#allocation7], 0 }
   0x9   :  { %21 = vsyncpa [#allocation7 + $0x1], 0 }
   0xa   :  { %22 = vsyncpa [#allocation10], 0 }
   0xb   :  { %23 = vsyncpa [#allocation5], 0 }
   0xc   :  { %25 = vsyncpa [#allocation5 + $0x1], 0  ;;  %s1915_s17 = smov 0   ;;  %s1917_s18 = smov 0  }
   0xd   :  { %s1919_s19 = smov 0   ;;  %s1921_s20 = smov 0  }
   0xe LB: > { %2359 = sst [smem:[#allocation18_spill]] %s1821_s17  ;;  %s1936_s21 = sadd.s32 4294967295, %s1833_s20   ;;  %s1833_s20 = sphi %s1921_s20, %s2390_s20   ;;  %s1829_s19 = sphi %s1919_s19, %s2389_s19   ;;  %s1825_s18 = sphi %s1917_s18, %s2388_s18   ;;  %s1821_s17 = sphi %s1915_s17, %s2387_s17  }
   0xf   : > { %s1346_s22 = sadd.s32 4294967294, %s1833_s20   ;;  %p51_p0 = scmp.ne.s32.totalorder %s1825_s18, %s1821_s17 }
  0x10   : > { %p2347_p1 = scmp.eq.s32.totalorder %s1936_s21, 0  ;;  %p301_p3 = scmp.eq.s32.totalorder %s1346_s22, 1 }
  0x11   : > { %p1347_p5 = scmp.ge.s32.totalorder %s1833_s20, 1  ;;  %p308_p7 = scmp.lt.s32.totalorder %s1833_s20, 3 }
  0x12   : > { %p1945_p4 = por %p2347_p1, %p51_p0  ;;  %p1950_p6 = por %p301_p3, %p51_p0 }
  0x13   : > { %p1955_p8 = pnand %p1347_p5, %p308_p7  ;;  %s1835_s26 = smov [#allocation8]  }
  0x14   : > { %s2360_s23 = scalar_select %p1945_p4, 1, 0 }
  0x15   : > { %s2361_s24 = scalar_select %p1950_p6, 1, 0 }
  0x16   : > { %s2363_s25 = scalar_select %p1955_p8, 1, 0 }
  0x17   : > { %2362 = sst [smem:[#allocation19_spill]] %s2361_s24  ;;  %s320_s27 = sshll.u32 %s1835_s26, 4  ;;  %s1959_s27 = int_to_ptr.vmem [resolvable:$true] %s320_s27 }
  0x18   : > { %p1508_p9 = pneg %p1955_p8  ;;  %s1836_s29 = smov [#allocation9]  }
  0x19   : > { %s334_s30 = sshll.u32 %s1836_s29, 4  ;;  %s1837_s12 = smov [#allocation11]   ;;  %s1970_s30 = int_to_ptr.vmem [resolvable:$true] %s334_s30 }
  0x1a   : > { %p1966_p11 = pnand %p1508_p9, %p2347_p1  ;;  %s1972_s13 = sshll.u32 %s1837_s12, 4  ;;  %s351_s13 = int_to_ptr.vmem [resolvable:$true] %s1972_s13 }
  0x1b   : > { %s2365_s3 = sld [smem:[#allocation21_spill]] }
  0x1c   : > { %p1982_p13 = pneg %p1966_p11 }
  0x21   : > { %s1611_s16 = scalar_lea.hbm %s2365_s3, 256 }
  0x22   : > { %p1612_p12 = scmp.ne.s32.totalorder %s2365_s3, %s1611_s16  ;;  %p1618_p5 = scmp.lt.u32.totalorder %s1611_s16, %s2365_s3 }
  0x24   : > { %p1614_p0 = pnand %p1982_p13, %p1612_p12 }
  0x26   : > { %p1615_p3 = pneg %p1614_p0 }
  0x28   : > { %p1620_p7 = pnand %p1618_p5, %p1615_p3 }
  0x2a   : > { %1623 = shalt.err (!%p1620_p7)
}
  0x2b   : > { %s1624_s14 = scalar_lea.vmem %s1959_s27, 256  ;;  %p1632_p2 = scmp.lt.s32.totalorder %s1959_s27, %s1959_s27 }
  0x2c   : > { %p1625_p9 = scmp.ne.s32.totalorder %s1959_s27, %s1624_s14  ;;  %p1633_p6 = scmp.lt.s32.totalorder %s1624_s14, %s1624_s14 }
  0x2e   : > { %p1627_p10 = pnand %p1625_p9, %p1982_p13  ;;  %p1634_p12 = por %p1633_p6, %p1632_p2 }
  0x30   : > { %p1628_p1 = pneg %p1627_p10 }
  0x32   : > { %p1635_p0 = pnand %p1634_p12, %p1628_p1 }
  0x34   : > { %1638 = shalt.err (!%p1635_p0)
}
  0x35   : > { %s2352_s15 = smov 64   ;;  %s2353_s16 = smov 4  }
  0x36   : > { %1511 = dma.hbm_to_vmem [thread:$0]  (!%p1966_p11), %s2365_s3, 256, %s1959_s27, [#allocation7], %s2352_s15, %s2352_s15, %s2353_s16  }
  0x37   : > { %s1639_s14 = scalar_lea.hbm %s2338_s4, 16 }
  0x38   : > { %p1640_p1 = scmp.ne.s32.totalorder %s2338_s4, %s1639_s14  ;;  %p1646_p10 = scmp.lt.u32.totalorder %s1639_s14, %s2338_s4 }
  0x3a   : > { %p1642_p2 = pnand %p1640_p1, %p1982_p13 }
  0x3c   : > { %p1643_p6 = pneg %p1642_p2 }
  0x3e   : > { %p1648_p3 = pnand %p1646_p10, %p1643_p6 }
  0x40   : > { %1651 = shalt.err (!%p1648_p3)
}
  0x41   : > { %s1652_s27 = scalar_lea.vmem %s1970_s30, 16  ;;  %s1659_s11 = scalar_lea.vmem %s1970_s30, 32 }
  0x42   : > { %p1653_p5 = scmp.ne.s32.totalorder %s1970_s30, %s1652_s27  ;;  %p1660_p12 = scmp.lt.s32.totalorder %s1970_s30, %s1970_s30 }
  0x43   : > { %p1661_p0 = scmp.lt.s32.totalorder %s1659_s11, %s1652_s27 }
  0x44   : > { %p1655_p7 = pnand %p1653_p5, %p1982_p13 }
  0x45   : > { %p1662_p1 = por %p1661_p0, %p1660_p12 }
  0x46   : > { %p1656_p9 = pneg %p1655_p7 }
  0x48   : > { %p1663_p2 = pnand %p1662_p1, %p1656_p9 }
  0x4a   : > { %1666 = shalt.err (!%p1663_p2)
}
  0x4b   : > { %1514 = dma.hbm_to_vmem [thread:$0]  (!%p1966_p11), %s2338_s4, 16, %s1970_s30, [#allocation10]  }
  0x4c   : > { %s1667_s26 = scalar_lea.hbm %s2341_s7, 256 }
  0x4d   : > { %p1668_p6 = scmp.ne.s32.totalorder %s2341_s7, %s1667_s26  ;;  %p1674_p5 = scmp.lt.u32.totalorder %s1667_s26, %s2341_s7 }
  0x4f   : > { %p1670_p10 = pnand %p1668_p6, %p1982_p13 }
  0x51   : > { %p1671_p3 = pneg %p1670_p10 }
  0x53   : > { %p1676_p7 = pnand %p1674_p5, %p1671_p3 }
  0x55   : > { %1679 = shalt.err (!%p1676_p7)
}
  0x56   : > { %s1680_s11 = scalar_lea.vmem %s351_s13, 256  ;;  %p1688_p1 = scmp.lt.s32.totalorder %s351_s13, %s351_s13 }
  0x57   : > { %p1681_p9 = scmp.ne.s32.totalorder %s351_s13, %s1680_s11  ;;  %p1689_p2 = scmp.lt.s32.totalorder %s1680_s11, %s1680_s11 }
  0x59   : > { %p1683_p12 = pnand %p1681_p9, %p1982_p13  ;;  %p1690_p4 = por %p1689_p2, %p1688_p1 }
  0x5b   : > { %p1684_p0 = pneg %p1683_p12 }
  0x5d   : > { %p1691_p8 = pnand %p1690_p4, %p1684_p0 }
  0x5f   : > { %1694 = shalt.err (!%p1691_p8)
}
  0x60   : > { %1517 = dma.hbm_to_vmem [thread:$0]  (!%p1966_p11), %s2341_s7, 256, %s351_s13, [#allocation10], %s2352_s15, %s2352_s15, %s2353_s16  }
  0x61   : > { %s2053_s24 = sadd.s32 1, %s1833_s20   ;;  %s38_s10 = sadd.s32 1, %s1829_s19 }
  0x62   : > { %s35_s28 = ssub.s32 %s1833_s20, %s2053_s24  ;;  %p45_p8 = scmp.ne.s32.totalorder %s1829_s19, %s1825_s18 }
  0x63   : > { %p36_p4 = scmp.eq.s32.totalorder %s35_s28, 0  ;;  %p46_p13 = scmp.eq.s32.totalorder %s1833_s20, 0 }
  0x64   : > { %p1532_p6 = scmp.lt.s32.totalorder %s1833_s20, 2  ;;  %p2367_p3 = scmp.eq.s32.totalorder %s1936_s21, 1 }
  0x65   : > { %s2063_s17 = scalar_select %p36_p4, %s1829_s19, %s38_s10  }
  0x66   : > { %p47_p10 = por %p46_p13, %p45_p8  ;;  %p2067_p5 = por %p2367_p3, %p45_p8 }
  0x67   : > { %s2072_s26 = sand.u32 1, %s1829_s19   ;;  %s1353_s13 = sshll.u32 %s1833_s20, 6 }
  0x68   : > { %s1352_s29 = sshll.u32 %s2072_s26, 2  ;;  %s2369_s0 = sld [smem:[#allocation20_spill]] }
  0x69   : > { %s377_s11 = scalar_lea.vmem [#allocation3], %s1352_s29  ;;  %p2081_p11 = pnand %p1532_p6, %p47_p10 }
  0x6a   : > { %s384_s30 = sshll.u32 %s377_s11, 4  ;;  %s1354_s28 = sshll.u32 %s2072_s26, 3  ;;  %s2085_s30 = int_to_ptr.vmem [resolvable:$true] %s384_s30 }
  0x6b   : > { %s374_s10 = scalar_lea.sflag [#allocation4], %s2072_s26  ;;  %p1697_p9 = pneg %p2081_p11 }
  0x6e   : > { %s2079_s27 = scalar_lea.hbm %s2369_s0, %s1353_s13  ;;  %s1700_s12 = scalar_lea.hbm %s2369_s0, 128 }
  0x6f   : > { %s1695_s15 = scalar_lea.hbm %s2079_s27, 64  ;;  %p1701_p1 = scmp.lt.u32.totalorder %s2079_s27, %s2369_s0 }
  0x70   : > { %p1696_p7 = scmp.ne.s32.totalorder %s2079_s27, %s1695_s15  ;;  %p1702_p2 = scmp.lt.u32.totalorder %s1700_s12, %s1695_s15 }
  0x71   : > { %p1704_p8 = scmp.lt.u32.totalorder %s1695_s15, %s2079_s27 }
  0x72   : > { %p1698_p12 = pnand %p1697_p9, %p1696_p7  ;;  %p1703_p4 = por %p1702_p2, %p1701_p1 }
  0x74   : > { %p1699_p0 = pneg %p1698_p12  ;;  %p1705_p13 = por %p1704_p8, %p1703_p4 }
  0x76   : > { %p1706_p6 = pnand %p1705_p13, %p1699_p0 }
  0x78   : > { %1709 = shalt.err (!%p1706_p6)
}
  0x79   : > { %s1710_s16 = scalar_lea.vmem %s2085_s30, 64  ;;  %s1840_s13 = smov [#allocation3]  }
  0x7a   : > { %p1711_p10 = scmp.ne.s32.totalorder %s2085_s30, %s1710_s16  ;;  %s1715_s29 = sshll.u32 %s1840_s13, 4  ;;  %s1716_s29 = int_to_ptr.vmem [resolvable:$false] %s1715_s29 }
  0x7b   : > { %s1717_s14 = scalar_lea.vmem %s1716_s29, 128  ;;  %p1718_p12 = scmp.lt.s32.totalorder %s2085_s30, %s1716_s29 }
  0x7c   : > { %p1713_p3 = pnand %p1711_p10, %p1697_p9  ;;  %p1719_p1 = scmp.lt.s32.totalorder %s1717_s14, %s1710_s16 }
  0x7e   : > { %p1714_p7 = pneg %p1713_p3  ;;  %p1720_p2 = por %p1719_p1, %p1718_p12 }
  0x80   : > { %p1721_p4 = pnand %p1720_p2, %p1714_p7 }
  0x82   : > { %1724 = shalt.err (!%p1721_p4)
}
  0x83   : > { %1521 = dma.hbm_to_vmem [thread:$0]  (!%p2081_p11), %s2079_s27, 64, %s2085_s30, %s374_s10  }
  0x84   : > { %s395_s15 = scalar_lea.vmem [#allocation6], %s1354_s28  ;;  %s391_s11 = sand.u32 1, %s1833_s20  }
  0x85   : > { %s402_s12 = sshll.u32 %s395_s15, 4  ;;  %s1392_s13 = sshll.u32 %s1833_s20, 7  ;;  %s2117_s12 = int_to_ptr.vmem [resolvable:$true] %s402_s12 }
  0x86   : > { %s2123_s14 = scalar_lea.hbm %s2335_s1, %s1392_s13  ;;  %s2125_s0 = scalar_lea.sflag [#allocation7], %s391_s11 }
  0x87   : > { %s1725_s3 = scalar_lea.hbm %s2123_s14, 128  ;;  %s1730_s30 = scalar_lea.hbm %s2335_s1, 256 }
  0x88   : > { %p1726_p0 = scmp.ne.s32.totalorder %s2123_s14, %s1725_s3  ;;  %p1731_p6 = scmp.lt.u32.totalorder %s2123_s14, %s2335_s1 }
  0x89   : > { %p1732_p10 = scmp.lt.u32.totalorder %s1730_s30, %s1725_s3  ;;  %p1734_p7 = scmp.lt.u32.totalorder %s1725_s3, %s2123_s14 }
  0x8a   : > { %p1728_p8 = pnand %p1726_p0, %p1697_p9 }
  0x8b   : > { %p1733_p3 = por %p1732_p10, %p1731_p6 }
  0x8c   : > { %p1729_p13 = pneg %p1728_p8 }
  0x8d   : > { %p1735_p12 = por %p1734_p7, %p1733_p3 }
  0x8f   : > { %p1736_p1 = pnand %p1735_p12, %p1729_p13 }
  0x91   : > { %1739 = shalt.err (!%p1736_p1)
}
  0x92   : > { %s1740_s15 = scalar_lea.vmem %s2117_s12, 128  ;;  %s1841_s11 = smov [#allocation6]  }
  0x93   : > { %p1741_p2 = scmp.ne.s32.totalorder %s2117_s12, %s1740_s15  ;;  %s1745_s13 = sshll.u32 %s1841_s11, 4  ;;  %s1746_s13 = int_to_ptr.vmem [resolvable:$false] %s1745_s13 }
  0x94   : > { %s1747_s16 = scalar_lea.vmem %s1746_s13, 256  ;;  %p1748_p8 = scmp.lt.s32.totalorder %s2117_s12, %s1746_s13 }
  0x95   : > { %p1743_p4 = pnand %p1741_p2, %p1697_p9  ;;  %p1749_p6 = scmp.lt.s32.totalorder %s1747_s16, %s1740_s15 }
  0x97   : > { %p1744_p0 = pneg %p1743_p4  ;;  %p1750_p10 = por %p1749_p6, %p1748_p8 }
  0x99   : > { %p1751_p3 = pnand %p1750_p10, %p1744_p0 }
  0x9b   : > { %1754 = shalt.err (!%p1751_p3)
}
  0x9c   : > { %s2371_s3 = smov 4   ;;  %s2372_s29 = smov 64  }
  0x9d   : > { %1524 = dma.hbm_to_vmem [thread:$0]  (!%p2081_p11), %s2123_s14, 128, %s2117_s12, %s2125_s0, %s2372_s29, %s2372_s29, %s2371_s3  }
  0x9e   : > { %p2373_p9 = scmp.ne.s32.totalorder %s2363_s25, 0 }
  0x9f   : > { %s2157_s26 = sand.u32 (!%p2373_p9), 1, %s1825_s18   ;;  %p2374_p13 = scmp.ne.s32.totalorder (!%p2373_p9), %s2360_s23, 0 }
  0xa0   : > { %420 = sbr.rel (%p2373_p9) target bundleno = 1963 (0x7ab), region = 64  ;;  %s1358_s27 = sshll.u32 (!%p2373_p9), %s2157_s26, 2 }
  0xa1   : > { %s423_s30 = scalar_lea.sflag (!%p2373_p9), [#allocation4], %s2157_s26  ;;  %s2161_s28 = scalar_lea.vmem (!%p2373_p9), [#allocation3], %s1358_s27 }
  0xa7   : > { %1800 = dma.done.wait (%p2374_p13), %s423_s30, 64  }
  0xa8   : > { %1802 = vsyncadd (%p2374_p13), %s423_s30, 4294967232  ;;  %s431_s0 = sand.u32 1, %s1936_s21   ;;  %s1359_s25 = sshll.u32 %s2157_s26, 3 }
  0xa9   : > { %s432_s9 = scalar_lea.sflag [#allocation7], %s431_s0  ;;  %s435_s12 = scalar_lea.vmem [#allocation6], %s1359_s25 }
  0xaa   : > { %1804 = dma.done.wait (%p2374_p13), %s432_s9, 128  }
  0xab   : > { %1806 = vsyncadd (%p2374_p13), %s432_s9, 4294967168  ;;  %p2375_p11 = scmp.eq.s32.totalorder %s1936_s21, 0 }
  0xad   : > { %1808 = dma.done.wait (%p2375_p11), [#allocation7], 256   ;;  %p2376_p7 = pmov %p2375_p11 }
  0xaf   : > { %1810 = vsyncadd (%p2376_p7), [#allocation7], 4294967040  ;;  %p2377_p12 = pmov %p2376_p7 }
  0xb0   : > { %p2378_p1 = pmov %p2376_p7 }
  0xb1   : > { %1812 = dma.done.wait (%p2377_p12), [#allocation10], 272  }
  0xb2   : > { %1814 = vsyncadd (%p2378_p1), [#allocation10], 4294967024  ;;  %v1842_v0 = vmov 0.0   ;;  %vm1843_vm0 = vmmov 0   ;;  %v1586_v1 = vld [vmem:[%s2339_s5] sm:$0xff]   ;;  %v1587_v2 = vld [vmem:[#allocation8] sm:$0xff]  }
  0xb3   : > { %1426 = vmatprep.subr.bf16.mxu1 %v1842_v0  ;;  %1418 = vmatprep.subr.bf16.mxu0 %v1842_v0  ;;  %v1588_v3 = vld [vmem:[%s2339_s5 + $0x8] sm:$0xff]   ;;  %v1590_v4 = vld [vmem:[#allocation8 + $0x8] sm:$0xff]   ;;  %vm524_vm1 = vcmask 261120   ;;  %v1364_v7 = vld [vmem:[#allocation9] ss:$0 sm:$0xff]  ;;  %vm650_vm2 = vcmask 64512  }
  0xb4   : > { %1430 = vmatprep.mubr.msk.bf16.mxu1 %vm1843_vm0, %v1842_v0  ;;  %1422 = vmatprep.mubr.msk.bf16.mxu0 %vm1843_vm0, %v1842_v0  ;;  %v1589_v5 = vld [vmem:[%s435_s12] sm:$0xff]   ;;  %v2198_v6 = vld [vmem:[%s2161_s28] sm:$0xf]  ;;  %s1844_s16 = smov 112   ;;  %s1845_s3 = smov 120   ;;  %vm697_vm3 = vcmask 130048  }
  0xb5   : > { %1427 = vmatpush3.bf16.msra.mxu1 %v1586_v1  ;;  %1419 = vmatpush3.bf16.msra.mxu0 %v1587_v2  ;;  %v1368_v8 = vld [vmem:[%s2340_s6] ss:$0 sm:$0xff]  ;;  %s1846_s29 = smov 104   ;;  %p494_p2 = scmp.lt.s32.totalorder %s1936_s21, 1  ;;  %vm871_vm4 = vcmask 130112   ;;  %vm985_vm5 = vcmask 195712  }
  0xb6   : > { %1428 = vmatprep.subr.bf16.mxu1 %v1842_v0  ;;  %1420 = vmatprep.subr.bf16.mxu0 %v1842_v0  ;;  %s1847_s9 = smov 96   ;;  %s1848_s12 = smov 80   ;;  %vm1099_vm6 = vcmask 261312  }
  0xb7   : > { %s495_s27 = scalar_select %p494_p2, %s1936_s21, 1 }
  0xb8   : > { %s1849_s23 = smov 72   ;;  %s1850_s14 = smov 88  }
  0xb9   : > { %1429 = vmatpush3.bf16.msra.mxu1 %v1588_v3  ;;  %1421 = vmatpush3.bf16.msra.mxu0 %v1590_v4  ;;  %s496_s0 = scalar_lea.vmem %s2336_s2, %s495_s27  ;;  %s1851_s10 = smov 8  }
  0xba   : > { %1440 = vmatprep.subr.bf16.mxu1 %v1842_v0  ;;  %1434 = vmatprep.subr.bf16.mxu0 %v1842_v0  ;;  %v1373_v33 = vld [vmem:[%s496_s0] ss:$0 sm:$0xff]  ;;  %s1852_s15 = smov 16   ;;  %s1853_s11 = smov 24  }
  0xbb   : > { %s2379_s27 = sld [smem:[#allocation22_spill]]  ;;  %s2380_s0 = sld [smem:[#allocation23_spill]] }
  0xbc   : > { %1431 = vmatmul.mubr.msk.bf16.vlgmr.msra.gmra.mrb[0].mxu1 %vm524_vm1, %v1589_v5  ;;  %1423 = vmatmul.mubr.msk.bf16.vlgmr.msra.gmra.mrb[0].mxu0 %vm524_vm1, %v2198_v6  ;;  %s1203_s13 = scalar_lea.sflag [#allocation5], %s2157_s26 }
  0xbd   : > { %1442 = vmatprep.mubr.msk.bf16.mxu1 %vm1843_vm0, %v1842_v0  ;;  %1436 = vmatprep.mubr.msk.bf16.mxu0 %vm1843_vm0, %v1842_v0 }
 0x18f   : > { %v635_v9 = vpop.f32.mrb[0].mxu1  ;;  %v562_v11 = vpop.f32.mrb[0].mxu0 }
 0x190   : > { %v1432_v10 = vpop.f32.mrb[1].mxu1  ;;  %v563_v13 = vadd.f32 %v1364_v7, %v562_v11  ;;  %v1424_v14 = vpop.f32.mrb[1].mxu0  ;;  %v636_v15 = vadd.f32 %v1368_v8, %v635_v9 }
 0x191   : > { %v638_v12 = vpop.f32.mrb[2].mxu1  ;;  %v565_v18 = vpop.f32.mrb[2].mxu0 }
 0x192   : > { %v639_v16 = vadd.f32 %v1368_v8, %v638_v12  ;;  %v1433_v17 = vpop.f32.mrb[3].mxu1  ;;  %v568_v19 = vmul.f32 0.35355338, %v563_v13  ;;  %v1425_v20 = vpop.f32.mrb[3].mxu0 }
 0x194   : > { %v2212_v21 = vpack.c.bf16 %v639_v16, %v636_v15  ;;  %v569_v22 = vpack.c.bf16 %v568_v19, %v568_v19 }
 0x196   : > { %875 = vrot.lane.b32.xlu1 %v2212_v21, %s1844_s16  ;;  %761 = vrot.lane.b32.xlu0 %v2212_v21, %s1845_s3  ;;  %v655_v23 = vsel %vm650_vm2, %v2212_v21, 0 }
 0x197   : > { %1435 = vmatpush3.bf16.xpose.msra.mxu0 %v655_v23 }
 0x198   : > { %1446 = vmatprep.subr.bf16.mxu0 %v1842_v0 }
 0x19a   : > { %873 = vrot.lane.b32.xlu1 %v569_v22, %s1844_s16  ;;  %759 = vrot.lane.b32.xlu0 %v569_v22, %s1845_s3 }
 0x19e   : > { %987 = vrot.lane.b32.xlu1 %v569_v22, %s1846_s29  ;;  %989 = vrot.lane.b32.xlu0 %v2212_v21, %s1846_s29 }
 0x19f   : > { %1437 = vmatmul.mubr.msk.bf16.vlgmr.msra.gmra.mrb[4].mxu0 %vm650_vm2, %v569_v22 }
 0x1a0   : > { %1448 = vmatprep.mubr.msk.bf16.mxu0 %vm1843_vm0, %v1842_v0 }
 0x208   : > { %v762_v24 = vpop.permute.xlu0 %761  ;;  %v876_v26 = vpop.permute.xlu1 %875 }
 0x209   : > { %v767_v25 = vsel %vm650_vm2, %v762_v24, 0  ;;  %v881_v28 = vsel %vm650_vm2, %v876_v26, 0 }
 0x20a   : > { %1447 = vmatpush3.bf16.xpose.msra.mxu0 %v767_v25 }
 0x20b   : > { %1458 = vmatprep.subr.bf16.mxu0 %v1842_v0 }
 0x20c   : > { %v760_v27 = vpop.permute.xlu0 %759  ;;  %v874_v30 = vpop.permute.xlu1 %873 }
 0x210   : > { %v990_v29 = vpop.permute.xlu0 %989  ;;  %v988_v32 = vpop.permute.xlu1 %987 }
 0x211   : > { %1449 = vmatmul.mubr.msk.bf16.vlgmr.msra.gmra.mrb[8].mxu0 %vm650_vm2, %v760_v27  ;;  %v995_v31 = vsel %vm650_vm2, %v990_v29, 0 }
 0x212   : > { %1459 = vmatpush3.bf16.xpose.msra.mxu0 %v881_v28  ;;  %1460 = vmatprep.mubr.msk.bf16.mxu0 %vm1843_vm0, %v1842_v0 }
 0x213   : > { %1470 = vmatprep.subr.bf16.mxu0 %v1842_v0 }
 0x219   : > { %1461 = vmatmul.mubr.msk.bf16.vlgmr.msra.gmra.mrb[12].mxu0 %vm650_vm2, %v874_v30 }
 0x21a   : > { %1471 = vmatpush3.bf16.xpose.msra.mxu0 %v995_v31  ;;  %1472 = vmatprep.mubr.msk.bf16.mxu0 %vm1843_vm0, %v1842_v0 }
 0x21b   : > { %1482 = vmatprep.subr.bf16.mxu0 %v1842_v0 }
 0x221   : > { %1473 = vmatmul.mubr.msk.bf16.vlgmr.msra.gmra.mrb[16].mxu0 %vm650_vm2, %v988_v32 }
 0x222   : > { %1486 = vmatprep.mubr.msk.bf16.mxu0 %vm1843_vm0, %v1842_v0 }
 0x272   : > { %v691_v34 = vpop.f32.mrb[4].mxu0 }
 0x273   : > { %v692_v35 = vadd.f32 %v1373_v33, %v691_v34  ;;  %v1438_v36 = vpop.f32.mrb[5].mxu0 }
 0x274   : > { %v694_v37 = vpop.f32.mrb[6].mxu0 }
 0x275   : > { %v1439_v38 = vpop.f32.mrb[7].mxu0  ;;  %v698_v39 = vsel %vm697_vm3, %v692_v35, -inf }
 0x276   : > { %699 = vmax.xlane.f32.xlu0 %v698_v39 }
 0x2e4   : > { %v803_v40 = vpop.f32.mrb[8].mxu0 }
 0x2e5   : > { %v804_v41 = vadd.f32 %v1373_v33, %v803_v40  ;;  %v1450_v42 = vpop.f32.mrb[9].mxu0 }
 0x2e6   : > { %v806_v43 = vpop.f32.mrb[10].mxu0 }
 0x2e7   : > { %v1451_v44 = vpop.f32.mrb[11].mxu0  ;;  %v809_v45 = vsel %vm697_vm3, %v804_v41, -inf }
 0x2e8   : > { %810 = vmax.xlane.f32.xlu1 %v809_v45  ;;  %v1591_v44 = vld [vmem:[#allocation11] sm:$0xff]   ;;  %v1592_v45 = vld [vmem:[#allocation11 + $0x8] sm:$0xff]  }
 0x2e9   : > { %1483 = vmatpush3.bf16.msra.mxu0 %v1591_v44 }
 0x2ea   : > { %1484 = vmatprep.subr.bf16.mxu0 %v1842_v0 }
 0x2ec   : > { %v917_v46 = vpop.f32.mrb[12].mxu0 }
 0x2ed   : > { %v918_v47 = vadd.f32 %v1373_v33, %v917_v46  ;;  %v1462_v48 = vpop.f32.mrb[13].mxu0  ;;  %1485 = vmatpush3.bf16.msra.mxu0 %v1592_v45 }
 0x2ee   : > { %v920_v49 = vpop.f32.mrb[14].mxu0 }
 0x2ef   : > { %v1463_v50 = vpop.f32.mrb[15].mxu0  ;;  %v923_v51 = vsel %vm697_vm3, %v918_v47, -inf }
 0x2f0   : > { %924 = vmax.xlane.f32.xlu0 %v923_v51 }
 0x2f4   : > { %v1031_v52 = vpop.f32.mrb[16].mxu0 }
 0x2f5   : > { %v1032_v53 = vadd.f32 %v1373_v33, %v1031_v52  ;;  %v1474_v54 = vpop.f32.mrb[17].mxu0 }
 0x2f6   : > { %v1034_v55 = vpop.f32.mrb[18].mxu0 }
 0x2f7   : > { %v1475_v56 = vpop.f32.mrb[19].mxu0  ;;  %v1037_v57 = vsel %vm697_vm3, %v1032_v53, -inf }
 0x2f8   : > { %1038 = vmax.xlane.f32.xlu0 %v1037_v57 }
 0x303   : > { %v700_v58 = vpop.xlane.xlu0 %699 }
 0x304   : > { %v701_v59 = vsub.f32 %v692_v35, %v700_v58  ;;  %v1382_v58 = vld [vmem:[%s2342_s8] ss:$0 sm:$0xff] }
 0x306   : > { %v702_v60 = vmul.f32 1.442695, %v701_v59  ;;  %v1169_v59 = vunpack.c.l.bf16 %v2198_v6 }
 0x308   : > { %1593 = vpow2.f32 %v702_v60 }
 0x312   : > { %v1594_v61 = vpop.eup %1593 }
 0x313   : > { %v704_v62 = vsel %vm697_vm3, %v1594_v61, 0.0 }
 0x314   : > { %705 = vadd.xlane.f32.xlu1 %v704_v62 }
 0x325   : > { %711 = vrot.lane.b32.xlu1 %v2212_v21, %s1847_s9  ;;  %s1389_s9 = sshll.u32 %s1936_s21, 7  ;;  %s1854_s21 = smov [#allocation12]  }
 0x375   : > { %v811_v63 = vpop.xlane.xlu1 %810 }
 0x376   : > { %v812_v1 = vsub.f32 %v804_v41, %v811_v63 }
 0x378   : > { %v813_v2 = vmul.f32 1.442695, %v812_v1 }
 0x37a   : > { %1595 = vpow2.f32 %v813_v2 }
 0x37d   : > { %v925_v3 = vpop.xlane.xlu0 %924 }
 0x37e   : > { %v926_v4 = vsub.f32 %v918_v47, %v925_v3 }
 0x380   : > { %v927_v5 = vmul.f32 1.442695, %v926_v4 }
 0x382   : > { %1597 = vpow2.f32 %v927_v5 }
 0x384   : > { %v1596_v7 = vpop.eup %1595 }
 0x385   : > { %v1039_v8 = vpop.xlane.xlu0 %1038  ;;  %v815_v9 = vsel %vm697_vm3, %v1596_v7, 0.0 }
 0x386   : > { %v1040_v10 = vsub.f32 %v1032_v53, %v1039_v8  ;;  %816 = vadd.xlane.f32.xlu0 %v815_v9 }
 0x388   : > { %v1041_v11 = vmul.f32 1.442695, %v1040_v10 }
 0x38a   : > { %1599 = vpow2.f32 %v1041_v11 }
 0x38c   : > { %v1598_v12 = vpop.eup %1597 }
 0x38d   : > { %v929_v13 = vsel %vm697_vm3, %v1598_v12, 0.0 }
 0x38e   : > { %930 = vadd.xlane.f32.xlu1 %v929_v13  ;;  %v1386_v13 = vld [vmem:[%s2379_s27] ss:$0 sm:$0xff] }
 0x394   : > { %v1600_v14 = vpop.eup %1599 }
 0x395   : > { %v1043_v15 = vsel %vm697_vm3, %v1600_v14, 0.0 }
 0x396   : > { %1044 = vadd.xlane.f32.xlu0 %v1043_v15  ;;  %v1387_v15 = vld [vmem:[%s2380_s0] ss:$0 sm:$0xff] }
 0x39f   : > { %935 = vrot.lane.b32.xlu1 %v2212_v21, %s1848_s12  ;;  %s493_s12 = scalar_lea.vmem [#allocation12], %s1359_s25  ;;  %s1759_s25 = sshll.u32 %s1854_s21, 4  ;;  %s1760_s25 = int_to_ptr.vmem [resolvable:$false] %s1759_s25 }
 0x3a0   : > { %s1761_s3 = scalar_lea.vmem %s1760_s25, 256 }
 0x3a1   : > { %v706_v16 = vpop.xlane.xlu1 %705 }
 0x3a2   : > { %1601 = vrcp.f32 %v706_v16 }
 0x3a3   : > { %1049 = vrot.lane.b32.xlu1 %v2212_v21, %s1849_s23  ;;  %s1216_s23 = sshll.u32 %s493_s12, 4  ;;  %s2291_s23 = int_to_ptr.vmem [resolvable:$true] %s1216_s23 }
 0x3a4   : > { %s1755_s16 = scalar_lea.vmem %s2291_s23, 128  ;;  %p1762_p6 = scmp.lt.s32.totalorder %s2291_s23, %s1760_s25 }
 0x3a5   : > { %v712_v17 = vpop.permute.xlu1 %711  ;;  %p1756_p4 = scmp.ne.s32.totalorder %s2291_s23, %s1755_s16  ;;  %p1763_p10 = scmp.lt.s32.totalorder %s1761_s3, %s1755_s16 }
 0x3a6   : > { %1441 = vmatpush3.bf16.msra.mxu1 %v712_v17 }
 0x3a7   : > { %1452 = vmatprep.subr.bf16.mxu1 %v1842_v0  ;;  %p1757_p0 = pnand %p1756_p4, %p2067_p5  ;;  %p1764_p3 = por %p1763_p10, %p1762_p6 }
 0x3a9   : > { %p1758_p8 = pneg %p1757_p0 }
 0x3ab   : > { %p1765_p9 = pnand %p1764_p3, %p1758_p8 }
 0x3ac   : > { %v1602_v18 = vpop.eup %1601  ;;  %821 = vrot.lane.b32.xlu0 %v2212_v21, %s1850_s14 }
 0x3ad   : > { %v708_v19 = vmul.f32 %v1602_v18, %v1594_v61 }
 0x3af   : > { %v709_v20 = vpack.c.bf16 %v708_v19, %v708_v19 }
 0x3b1   : > { %1443 = vmatmul.mubr.msk.bf16.vlgmr.msra.gmra.mrb[4].mxu1 %vm697_vm3, %v709_v20 }
 0x3b2   : > { %1454 = vmatprep.mubr.msk.bf16.mxu1 %vm1843_vm0, %v1842_v0 }
 0x413   : > { %v817_v22 = vpop.xlane.xlu0 %816 }
 0x414   : > { %1603 = vrcp.f32 %v817_v22 }
 0x41b   : > { %v931_v23 = vpop.xlane.xlu1 %930 }
 0x41c   : > { %1605 = vrcp.f32 %v931_v23 }
 0x41e   : > { %v1604_v24 = vpop.eup %1603 }
 0x41f   : > { %v819_v26 = vmul.f32 %v1604_v24, %v1596_v7  ;;  %v936_v29 = vpop.permute.xlu1 %935 }
 0x421   : > { %v820_v28 = vpack.c.bf16 %v819_v26, %v819_v26 }
 0x423   : > { %v1045_v25 = vpop.xlane.xlu0 %1044  ;;  %v1050_v33 = vpop.permute.xlu1 %1049 }
 0x424   : > { %1607 = vrcp.f32 %v1045_v25 }
 0x426   : > { %v1606_v21 = vpop.eup %1605 }
 0x427   : > { %v822_v27 = vpop.permute.xlu0 %821  ;;  %v933_v30 = vmul.f32 %v1606_v21, %v1598_v12 }
 0x428   : > { %1453 = vmatpush3.bf16.msra.mxu1 %v822_v27 }
 0x429   : > { %1464 = vmatprep.subr.bf16.mxu1 %v1842_v0  ;;  %v934_v31 = vpack.c.bf16 %v933_v30, %v933_v30 }
 0x42b   : > { %1455 = vmatmul.mubr.msk.bf16.vlgmr.msra.gmra.mrb[8].mxu1 %vm697_vm3, %v820_v28 }
 0x42c   : > { %1465 = vmatpush3.bf16.msra.mxu1 %v936_v29  ;;  %1466 = vmatprep.mubr.msk.bf16.mxu1 %vm1843_vm0, %v1842_v0 }
 0x42d   : > { %1476 = vmatprep.subr.bf16.mxu1 %v1842_v0 }
 0x42e   : > { %v1608_v32 = vpop.eup %1607 }
 0x42f   : > { %v1047_v34 = vmul.f32 %v1608_v32, %v1600_v14 }
 0x431   : > { %v1048_v35 = vpack.c.bf16 %v1047_v34, %v1047_v34 }
 0x433   : > { %1467 = vmatmul.mubr.msk.bf16.vlgmr.msra.gmra.mrb[12].mxu1 %vm697_vm3, %v934_v31 }
 0x434   : > { %1477 = vmatpush3.bf16.msra.mxu1 %v1050_v33  ;;  %1478 = vmatprep.mubr.msk.bf16.mxu1 %vm1843_vm0, %v1842_v0 }
 0x43b   : > { %1479 = vmatmul.mubr.msk.bf16.vlgmr.msra.gmra.mrb[16].mxu1 %vm697_vm3, %v1048_v35 }
 0x484   : > { %v751_v36 = vpop.f32.mrb[4].mxu1 }
 0x485   : > { %757 = vst.msk [vmem:[#allocation2] sm:$0xff] %vm650_vm2, %v751_v36  ;;  %v1444_v37 = vpop.f32.mrb[5].mxu1 }
 0x486   : > { %v754_v38 = vpop.f32.mrb[6].mxu1 }
 0x487   : > { %v1445_v39 = vpop.f32.mrb[7].mxu1 }
 0x4fe   : > { %v861_v40 = vpop.f32.mrb[8].mxu1 }
 0x4ff   : > { %868 = vrot.lane.b32.xlu0 %v861_v40, %s1851_s10  ;;  %v1456_v41 = vpop.f32.mrb[9].mxu1 }
 0x500   : > { %v864_v42 = vpop.f32.mrb[10].mxu1 }
 0x501   : > { %v1457_v43 = vpop.f32.mrb[11].mxu1 }
 0x506   : > { %v975_v46 = vpop.f32.mrb[12].mxu1 }
 0x507   : > { %982 = vrot.lane.b32.xlu1 %v975_v46, %s1852_s15  ;;  %v1468_v47 = vpop.f32.mrb[13].mxu1  ;;  %s2381_s15 = sld [smem:[#allocation24_spill]] }
 0x508   : > { %v978_v48 = vpop.f32.mrb[14].mxu1 }
 0x509   : > { %v1469_v49 = vpop.f32.mrb[15].mxu1 }
 0x50e   : > { %v1089_v50 = vpop.f32.mrb[16].mxu1 }
 0x50f   : > { %1096 = vrot.lane.b32.xlu0 %v1089_v50, %s1853_s11  ;;  %v1480_v51 = vpop.f32.mrb[17].mxu1  ;;  %s2289_s11 = scalar_lea.hbm %s2381_s15, %s1389_s9 }
 0x510   : > { %v1092_v52 = vpop.f32.mrb[18].mxu1 }
 0x511   : > { %v1481_v53 = vpop.f32.mrb[19].mxu1 }
 0x571   : > { %v869_v54 = vpop.permute.xlu0 %868 }
 0x572   : > { %872 = vst.msk [vmem:[#allocation2] sm:$0xff] %vm871_vm4, %v869_v54 }
 0x579   : > { %v983_v55 = vpop.permute.xlu1 %982 }
 0x57a   : > { %986 = vst.msk [vmem:[#allocation2] sm:$0xff] %vm985_vm5, %v983_v55 }
 0x581   : > { %v1097_v0 = vpop.permute.xlu0 %1096 }
 0x582   : > { %1100 = vst.msk [vmem:[#allocation2] sm:$0xff] %vm1099_vm6, %v1097_v0 }
 0x589   : > { %v1101_v56 = vld [vmem:[#allocation2] sm:$0xff] }
 0x58a   : > { %v1102_v57 = vpack.c.bf16 %v1101_v56, %v1101_v56 }
 0x58c   : > { %1487 = vmatmul.mubr.msk.bf16.vlgmr.msra.gmra.mrb[20].mxu0 %vm524_vm1, %v1102_v57 }
 0x65f   : > { %v1163_v60 = vpop.f32.mrb[20].mxu0 }
 0x660   : > { %v1164_v61 = vadd.f32 %v1382_v58, %v1163_v60  ;;  %v1488_v62 = vpop.f32.mrb[21].mxu0 }
 0x661   : > { %v1166_v63 = vpop.f32.mrb[22].mxu0 }
 0x662   : > { %v1489_v1 = vpop.f32.mrb[23].mxu0  ;;  %v1170_v2 = vadd.f32 %v1169_v59, %v1164_v61 }
 0x664   : > { %v1171_v3 = vsel %vm524_vm1, %v1170_v2, 0.0 }
 0x665   : > { %1172 = vadd.xlane.f32.xlu1 %v1171_v3 }
 0x6f2   : > { %v1173_v4 = vpop.xlane.xlu1 %1172 }
 0x6f3   : > { %v1175_v5 = vmul.f32 0.03125, %v1173_v4 }
 0x6f5   : > { %v1176_v7 = vsub.f32 %v1170_v2, %v1175_v5 }
 0x6f7   : > { %v1177_v8 = vmul.f32 %v1176_v7, %v1176_v7 }
 0x6f9   : > { %v1178_v9 = vsel %vm524_vm1, %v1177_v8, 0.0 }
 0x6fa   : > { %1179 = vadd.xlane.f32.xlu0 %v1178_v9 }
 0x787   : > { %v1180_v10 = vpop.xlane.xlu0 %1179 }
 0x788   : > { %v1181_v6 = vmul.f32 0.03125, %v1180_v10 }
 0x78a   : > { %v1182_v11 = vadd.f32 1e-12, %v1181_v6 }
 0x78c   : > { %1609 = vrsqrt.f32 %v1182_v11 }
 0x796   : > { %v1610_v12 = vpop.eup %1609 }
 0x797   : > { %v1184_v14 = vmul.f32 %v1610_v12, %v1176_v7 }
 0x799   : > { %v1192_v16 = vmul.f32 %v1386_v13, %v1184_v14 }
 0x79b   : > { %v1200_v17 = vadd.f32 %v1387_v15, %v1192_v16 }
 0x79d   : > { %1201 = vst.msk [vmem:[%s493_s12] sm:$0xff] %vm524_vm1, %v1200_v17 }
 0x79e   : > { %1768 = shalt.err (!%p1765_p9)
}
 0x79f   : > { %s1769_s26 = scalar_lea.hbm %s2289_s11, 128  ;;  %s1773_s30 = scalar_lea.hbm %s2381_s15, 256 }
 0x7a0   : > { %p1770_p13 = scmp.ne.s32.totalorder %s2289_s11, %s1769_s26  ;;  %p1774_p12 = scmp.lt.u32.totalorder %s2289_s11, %s2381_s15 }
 0x7a1   : > { %p1775_p1 = scmp.lt.u32.totalorder %s1773_s30, %s1769_s26  ;;  %p1777_p4 = scmp.lt.u32.totalorder %s1769_s26, %s2289_s11 }
 0x7a2   : > { %p1771_p11 = pnand %p1770_p13, %p2067_p5 }
 0x7a3   : > { %p1776_p2 = por %p1775_p1, %p1774_p12 }
 0x7a4   : > { %p1772_p7 = pneg %p1771_p11 }
 0x7a5   : > { %p1778_p0 = por %p1777_p4, %p1776_p2 }
 0x7a7   : > { %p1779_p8 = pnand %p1778_p0, %p1772_p7 }
 0x7a9   : > { %1782 = shalt.err (!%p1779_p8)
}
 0x7aa   : > { %1506 = dma.vmem_to_hbm [thread:$0]  (%p2067_p5), %s2291_s23, 128, %s2289_s11, %s1203_s13  }
 0x7ab PF: > { %s2382_s9 = sld [smem:[#allocation18_spill]]  ;;  %s2383_s12 = sld [smem:[#allocation19_spill]] }
 0x7ac   : > { %p2385_p10 = scmp.ge.s32.totalorder %s1833_s20, 2 }
 0x7b1   : > { %s1228_s14 = sand.u32 1, %s2382_s9   ;;  %p2384_p6 = scmp.ne.s32.totalorder %s2383_s12, 0 }
 0x7b2   : > { %s1229_s10 = scalar_lea.sflag [#allocation5], %s1228_s14 }
 0x7b3   : > { %p1526_p3 = pnand %p2385_p10, %p2384_p6 }
 0x7b5   : > { %1816 = dma.done.wait (!%p1526_p3), %s1229_s10, 128  }
 0x7b6   : > { %1818 = vsyncadd (!%p1526_p3), %s1229_s10, 4294967168  ;;  %s2386_s16 = smov %s2063_s17  ;;  %p28_p9 = scmp.ge.s32.totalorder %s2053_s24, 4  }
 0x7b7   : > { %s2387_s17 = smov %s1825_s18  ;;  %s2388_s18 = smov %s1829_s19 }
 0x7b8   : > { %s2389_s19 = smov %s2386_s16  ;;  %s2390_s20 = smov %s2053_s24 }
 0x7b9   :  { %30 = sbr.rel (!%p28_p9) target bundleno = 14 (0xe), region = 137 }
 0x7c0   :  { %1234 = vsyncpa [#allocation4], 1 }
 0x7c1   :  { %1236 = vsyncpa [#allocation4 + $0x1], 1 }
 0x7c2   :  { %1237 = vsyncpa [#allocation7], 1 }
 0x7c3   :  { %1239 = vsyncpa [#allocation7 + $0x1], 1 }
 0x7c4   :  { %1240 = vsyncpa [#allocation10], 1 }
 0x7c5   :  { %1241 = vsyncpa [#allocation5], 1 }
 0x7c6   :  { %1243 = vsyncpa [#allocation5 + $0x1], 1 }

</bundles_post_ra>
